<compile_context>
chip_gen: v7x
topology: tpu7x:2x2x1
jax: 0.10.0
libtpu: 0.0.40
codegen_flags: <defaults>
</compile_context>

<pallas_src>
import functools

import jax
import jax.numpy as jnp
from jax.experimental import pallas as pl
from jax.experimental.pallas import tpu as pltpu

# Large finite negative instead of -inf: rows that are fully masked yield a
# uniform average of v instead of NaN (PyTorch would produce NaN there).
_MASK_BIAS = -1e30


def _pick_tile(n, candidates):
    for c in candidates:
        if n % c == 0:
            return c
    return n


def _flash_sdpa_kernel(seed_ref,                        # scalar prefetch (SMEM)
                       q_ref, k_ref, v_ref, bias_ref,   # input tiles (VMEM)
                       o_ref,                           # output tile (VMEM)
                       m_sc, l_sc, acc_sc,              # VMEM scratch
                       *, inv_scale, dropout_rate, training, tq, tk):
    b = pl.program_id(0)
    qi = pl.program_id(1)
    h = pl.program_id(2)
    ki = pl.program_id(3)

    @pl.when(ki == 0)
    def _init():
        m_sc[...] = jnp.full_like(m_sc, _MASK_BIAS)
        l_sc[...] = jnp.zeros_like(l_sc)
        acc_sc[...] = jnp.zeros_like(acc_sc)

    # Fold 1/scale into the (small) q tile; keep native dtype for the MXU.
    q = q_ref[0, 0] * inv_scale            # [tq, D]
    k = k_ref[0, 0]                        # [tk, D]
    v = v_ref[0, 0]                        # [tk, Dv]

    # scores = q @ k^T without materializing a transpose (contract on D).
    s = jax.lax.dot_general(q, k, (((1,), (1,)), ((), ())),
                            preferred_element_type=jnp.float32)   # [tq, tk] f32
    s = s + bias_ref[0].astype(jnp.float32)

    m_prev = m_sc[...]                                            # [tq, 1]
    m_new = jnp.maximum(m_prev, jnp.max(s, axis=-1, keepdims=True))
    alpha = jnp.exp(m_prev - m_new)                               # [tq, 1]
    p = jnp.exp(s - m_new)                                        # [tq, tk]

    # Softmax denominator uses the *pre-dropout* probabilities (the reference
    # module applies dropout after softmax).
    l_sc[...] = alpha * l_sc[...] + jnp.sum(p, axis=-1, keepdims=True)
    m_sc[...] = m_new

    if training and dropout_rate > 0.0:
        # Stateless counter-based dropout: hash the global (b, h, row, col)
        # coordinate into uniform bits and compare against an integer
        # threshold.  Deterministic and unique per attention entry regardless
        # of tiling; the 1/(1-p) rescale is folded into the finalize step.
        n_heads = pl.num_programs(2)
        n_q = pl.num_programs(1) * tq
        n_k = pl.num_programs(3) * tk
        row = jax.lax.broadcasted_iota(jnp.int32, (tq, tk), 0) + qi * tq
        col = jax.lax.broadcasted_iota(jnp.int32, (tq, tk), 1) + ki * tk
        flat = ((b * n_heads + h) * n_q + row) * n_k + col
        x = flat.astype(jnp.uint32) ^ seed_ref[0].astype(jnp.uint32)
        x = (x ^ (x >> 16)) * jnp.uint32(0x7FEB352D)
        x = (x ^ (x >> 15)) * jnp.uint32(0x846CA68B)
        x = x ^ (x >> 16)
        thresh = jnp.uint32(min(int(round(dropout_rate * (1 << 32))),
                                (1 << 32) - 1))
        p = jnp.where(x >= thresh, p, 0.0)

    acc_sc[...] = alpha * acc_sc[...] + jnp.dot(
        p.astype(v.dtype), v, preferred_element_type=jnp.float32)

    @pl.when(ki == pl.num_programs(3) - 1)
    def _finalize():
        keep_scale = (1.0 / (1.0 - dropout_rate)
                      if (training and dropout_rate > 0.0) else 1.0)
        inv_l = pl.reciprocal(l_sc[...], approx=True)             # [tq, 1]
        o_ref[0, 0] = (acc_sc[...] * (inv_l * keep_scale)).astype(o_ref.dtype)


def scaled_dot_product_attention(q, k, v, mask, *, scale, dropout=0.1,
                                 training=True, seed=0):
    """q:[B,H,Lq,D], k:[B,H,Lk,D], v:[B,H,Lk,Dv], mask:[B,Lq,Lk] bool."""
    B, H, Lq, D = q.shape
    Lk = k.shape[2]
    Dv = v.shape[3]

    tq = _pick_tile(Lq, (256, 128))
    tk = _pick_tile(Lk, (512, 256, 128))

    # Additive mask bias in bf16: 4x less HBM/VMEM traffic than an int32 mask,
    # and the in-kernel compare+select becomes a single add.
    bias = jnp.where(mask, 0.0, _MASK_BIAS).astype(jnp.bfloat16)
    seed_arr = jnp.asarray([seed], dtype=jnp.int32)

    kernel = functools.partial(
        _flash_sdpa_kernel,
        inv_scale=1.0 / float(scale),
        dropout_rate=float(dropout),
        training=bool(training),
        tq=tq, tk=tk)

    grid = (B, Lq // tq, H, Lk // tk)

    # TODO(synk): Dv < 128 leaves output stores lane-sparse; a (B, Lq, H*Dv)
    # output layout would be lane-dense but changes the module interface.
    return pl.pallas_call(
        kernel,
        out_shape=jax.ShapeDtypeStruct((B, H, Lq, Dv), q.dtype),
        grid_spec=pltpu.PrefetchScalarGridSpec(
            num_scalar_prefetch=1,
            grid=grid,
            in_specs=[
                pl.BlockSpec((1, 1, tq, D),
                             lambda b, qi, h, ki, s: (b, h, qi, 0)),   # q
                pl.BlockSpec((1, 1, tk, D),
                             lambda b, qi, h, ki, s: (b, h, ki, 0)),   # k
                pl.BlockSpec((1, 1, tk, Dv),
                             lambda b, qi, h, ki, s: (b, h, ki, 0)),   # v
                # Mask bias depends only on (b, qi, ki); with h inner of qi it
                # stays resident across heads whenever Lk fits in one tile.
                pl.BlockSpec((1, tq, tk),
                             lambda b, qi, h, ki, s: (b, qi, ki)),     # bias
            ],
            out_specs=pl.BlockSpec(
                (1, 1, tq, Dv), lambda b, qi, h, ki, s: (b, h, qi, 0)),
            scratch_shapes=[
                pltpu.VMEM((tq, 1), jnp.float32),    # running max m
                pltpu.VMEM((tq, 1), jnp.float32),    # running denom l
                pltpu.VMEM((tq, Dv), jnp.float32),   # running output acc
            ],
        ),
        compiler_params=pltpu.CompilerParams(
            dimension_semantics=("parallel", "parallel", "parallel",
                                 "arbitrary")),
    )(seed_arr, q, k, v, bias)


if __name__ == "__main__":
    B, H, Lq, Lk, D, Dv = 2, 2, 8, 8, 32, 32
    scale = float(D) ** 0.5

    key = jax.random.PRNGKey(0)
    kq, kk, kv, km = jax.random.split(key, 4)
    q = jax.random.normal(kq, (B, H, Lq, D), dtype=jnp.float32)
    k = jax.random.normal(kk, (B, H, Lk, D), dtype=jnp.float32)
    v = jax.random.normal(kv, (B, H, Lk, Dv), dtype=jnp.float32)
    mask = jax.random.bernoulli(km, 0.8, (B, Lq, Lk))
    # guarantee at least one attendable key per query row
    mask = mask.at[:, :, 0].set(True)

    out = scaled_dot_product_attention(
        q, k, v, mask, scale=scale, dropout=0.1, training=True, seed=42)
    jax.block_until_ready(out)

    assert out.shape == (B, H, Lq, Dv)
    assert bool(jnp.all(jnp.isfinite(out)))
    print("KERNEL_OK")
</pallas_src>

<mosaic_0001>
module attributes {stable_mosaic.version = 11 : i64} {
  func.func @_flash_sdpa_kernel(%arg0: i32, %arg1: i32, %arg2: i32, %arg3: i32, %arg4: memref<1xi32, #tpu.memory_space<smem>>, %arg5: memref<1x1x8x32xf32, #tpu.memory_space<vmem>>, %arg6: memref<1x1x8x32xf32, #tpu.memory_space<vmem>>, %arg7: memref<1x1x8x32xf32, #tpu.memory_space<vmem>>, %arg8: memref<1x8x8xbf16, #tpu.memory_space<vmem>>, %arg9: memref<1x1x8x32xf32, #tpu.memory_space<vmem>>, %arg10: memref<8x1xf32, #tpu.memory_space<vmem>>, %arg11: memref<8x1xf32, #tpu.memory_space<vmem>>, %arg12: memref<8x32xf32, #tpu.memory_space<vmem>>) attributes {dimension_semantics = [#tpu.dimension_semantics<parallel>, #tpu.dimension_semantics<parallel>, #tpu.dimension_semantics<parallel>, #tpu.dimension_semantics<arbitrary>], iteration_bounds = array<i64: 2, 1, 2, 1>, scalar_prefetch = 1 : i64, scratch_operands = 3 : i64, tpu.core_type = #tpu.core_type<tc>, window_params = [{transform_indices = @transform_0, window_bounds = array<i64: 1, 1, 8, 32>}, {transform_indices = @transform_1, window_bounds = array<i64: 1, 1, 8, 32>}, {transform_indices = @transform_2, window_bounds = array<i64: 1, 1, 8, 32>}, {transform_indices = @transform_3, window_bounds = array<i64: 1, 8, 8>}, {transform_indices = @transform_4, window_bounds = array<i64: 1, 1, 8, 32>}]} {
    %c0_i32 = arith.constant 0 : i32
    %0 = arith.cmpi eq, %arg3, %c0_i32 : i32
    %1 = arith.extui %0 : i1 to i32
    %c0_i32_0 = arith.constant 0 : i32
    %2 = arith.cmpi ne, %1, %c0_i32_0 : i32
    scf.if %2 {
      %cst_39 = arith.constant -1.000000e+30 : f32
      %77 = vector.broadcast %cst_39 : f32 to vector<8x1xf32>
      %c0_40 = arith.constant 0 : index
      %c0_41 = arith.constant 0 : index
      %78 = vector.load %arg10[%c0_40, %c0_41] : memref<8x1xf32, #tpu.memory_space<vmem>>, vector<8x1xf32>
      tpu.vector_store %arg10[%c0_40, %c0_41], %77 {strides = array<i32>} : memref<8x1xf32, #tpu.memory_space<vmem>>, vector<8x1xf32>,
      %cst_42 = arith.constant 0.000000e+00 : f32
      %79 = vector.broadcast %cst_42 : f32 to vector<8x1xf32>
      %c0_43 = arith.constant 0 : index
      %c0_44 = arith.constant 0 : index
      %80 = vector.load %arg11[%c0_43, %c0_44] : memref<8x1xf32, #tpu.memory_space<vmem>>, vector<8x1xf32>
      tpu.vector_store %arg11[%c0_43, %c0_44], %79 {strides = array<i32>} : memref<8x1xf32, #tpu.memory_space<vmem>>, vector<8x1xf32>,
      %cst_45 = arith.constant 0.000000e+00 : f32
      %81 = vector.broadcast %cst_45 : f32 to vector<8x32xf32>
      %c0_46 = arith.constant 0 : index
      %c0_47 = arith.constant 0 : index
      %82 = vector.load %arg12[%c0_46, %c0_47] : memref<8x32xf32, #tpu.memory_space<vmem>>, vector<8x32xf32>
      tpu.vector_store %arg12[%c0_46, %c0_47], %81 {strides = array<i32>} : memref<8x32xf32, #tpu.memory_space<vmem>>, vector<8x32xf32>,
    } else {
    }
    %c0 = arith.constant 0 : index
    %c0_1 = arith.constant 0 : index
    %c0_2 = arith.constant 0 : index
    %c0_3 = arith.constant 0 : index
    %3 = vector.load %arg5[%c0, %c0_1, %c0_2, %c0_3] : memref<1x1x8x32xf32, #tpu.memory_space<vmem>>, vector<1x1x8x32xf32>
    %4 = vector.shape_cast %3 : vector<1x1x8x32xf32> to vector<8x32xf32>
    %cst = arith.constant 0.176776692 : f32
    %5 = vector.broadcast %cst : f32 to vector<8x32xf32>
    %6 = arith.mulf %4, %5 : vector<8x32xf32>
    %c0_4 = arith.constant 0 : index
    %c0_5 = arith.constant 0 : index
    %c0_6 = arith.constant 0 : index
    %c0_7 = arith.constant 0 : index
    %7 = vector.load %arg6[%c0_4, %c0_5, %c0_6, %c0_7] : memref<1x1x8x32xf32, #tpu.memory_space<vmem>>, vector<1x1x8x32xf32>
    %8 = vector.shape_cast %7 : vector<1x1x8x32xf32> to vector<8x32xf32>
    %c0_8 = arith.constant 0 : index
    %c0_9 = arith.constant 0 : index
    %c0_10 = arith.constant 0 : index
    %c0_11 = arith.constant 0 : index
    %9 = vector.load %arg7[%c0_8, %c0_9, %c0_10, %c0_11] : memref<1x1x8x32xf32, #tpu.memory_space<vmem>>, vector<1x1x8x32xf32>
    %10 = vector.shape_cast %9 : vector<1x1x8x32xf32> to vector<8x32xf32>
    %cst_12 = arith.constant dense<0.000000e+00> : vector<8x8xf32>
    %11 = tpu.matmul %6, %8, %cst_12 {dimension_numbers = #tpu.dot_dimension_numbers<[1], [1], [0], [0], [0, 0, 1, 0], [], []>} : vector<8x32xf32>, vector<8x32xf32>, vector<8x8xf32> -> vector<8x8xf32>
    %c0_13 = arith.constant 0 : index
    %c0_14 = arith.constant 0 : index
    %c0_15 = arith.constant 0 : index
    %12 = vector.load %arg8[%c0_13, %c0_14, %c0_15] : memref<1x8x8xbf16, #tpu.memory_space<vmem>>, vector<1x8x8xbf16>
    %13 = vector.shape_cast %12 : vector<1x8x8xbf16> to vector<8x8xbf16>
    %14 = arith.extf %13 : vector<8x8xbf16> to vector<8x8xf32>
    %15 = arith.addf %11, %14 : vector<8x8xf32>
    %c0_16 = arith.constant 0 : index
    %c0_17 = arith.constant 0 : index
    %16 = vector.load %arg10[%c0_16, %c0_17] : memref<8x1xf32, #tpu.memory_space<vmem>>, vector<8x1xf32>
    %cst_18 = arith.constant dense<0xFF800000> : vector<8xf32>
    %17 = vector.multi_reduction <maximumf>, %15, %cst_18 [1] : vector<8x8xf32> to vector<8xf32>
    %18 = vector.shape_cast %17 : vector<8xf32> to vector<8x1xf32>
    %19 = arith.maximumf %16, %18 : vector<8x1xf32>
    %20 = arith.subf %16, %19 : vector<8x1xf32>
    %21 = math.exp %20 : vector<8x1xf32>
    %22 = vector.broadcast %19 : vector<8x1xf32> to vector<8x8xf32>
    %23 = arith.subf %15, %22 : vector<8x8xf32>
    %24 = math.exp %23 : vector<8x8xf32>
    %c0_19 = arith.constant 0 : index
    %c0_20 = arith.constant 0 : index
    %25 = vector.load %arg11[%c0_19, %c0_20] : memref<8x1xf32, #tpu.memory_space<vmem>>, vector<8x1xf32>
    %26 = arith.mulf %21, %25 : vector<8x1xf32>
    %cst_21 = arith.constant dense<0.000000e+00> : vector<8xf32>
    %27 = vector.multi_reduction <add>, %24, %cst_21 [1] : vector<8x8xf32> to vector<8xf32>
    %28 = vector.shape_cast %27 : vector<8xf32> to vector<8x1xf32>
    %29 = arith.addf %26, %28 : vector<8x1xf32>
    %c0_22 = arith.constant 0 : index
    %c0_23 = arith.constant 0 : index
    %30 = vector.load %arg11[%c0_22, %c0_23] : memref<8x1xf32, #tpu.memory_space<vmem>>, vector<8x1xf32>
    tpu.vector_store %arg11[%c0_22, %c0_23], %29 {strides = array<i32>} : memref<8x1xf32, #tpu.memory_space<vmem>>, vector<8x1xf32>,
    %c0_24 = arith.constant 0 : index
    %c0_25 = arith.constant 0 : index
    %31 = vector.load %arg10[%c0_24, %c0_25] : memref<8x1xf32, #tpu.memory_space<vmem>>, vector<8x1xf32>
    tpu.vector_store %arg10[%c0_24, %c0_25], %19 {strides = array<i32>} : memref<8x1xf32, #tpu.memory_space<vmem>>, vector<8x1xf32>,
    %32 = tpu.iota {dimensions = array<i32: 0>} : vector<8x8xi32>
    %c8_i32 = arith.constant 8 : i32
    %33 = arith.muli %arg1, %c8_i32 : i32
    %34 = vector.broadcast %33 : i32 to vector<8x8xi32>
    %35 = arith.addi %32, %34 : vector<8x8xi32>
    %36 = tpu.iota {dimensions = array<i32: 1>} : vector<8x8xi32>
    %c8_i32_26 = arith.constant 8 : i32
    %37 = arith.muli %arg3, %c8_i32_26 : i32
    %38 = vector.broadcast %37 : i32 to vector<8x8xi32>
    %39 = arith.addi %36, %38 : vector<8x8xi32>
    %c2_i32 = arith.constant 2 : i32
    %40 = arith.muli %arg0, %c2_i32 : i32
    %41 = arith.addi %40, %arg2 : i32
    %c8_i32_27 = arith.constant 8 : i32
    %42 = arith.muli %41, %c8_i32_27 : i32
    %43 = vector.broadcast %42 : i32 to vector<8x8xi32>
    %44 = arith.addi %43, %35 : vector<8x8xi32>
    %c8_i32_28 = arith.constant 8 : i32
    %45 = vector.broadcast %c8_i32_28 : i32 to vector<8x8xi32>
    %46 = arith.muli %44, %45 : vector<8x8xi32>
    %47 = arith.addi %46, %39 : vector<8x8xi32>
    %c0_29 = arith.constant 0 : index
    %48 = memref.load %arg4[%c0_29] : memref<1xi32, #tpu.memory_space<smem>>
    %49 = vector.broadcast %48 : i32 to vector<8x8xi32>
    %50 = arith.xori %47, %49 : vector<8x8xi32>
    %c16_i32 = arith.constant 16 : i32
    %51 = vector.broadcast %c16_i32 : i32 to vector<8x8xi32>
    %52 = arith.shrui %50, %51 : vector<8x8xi32>
    %53 = arith.xori %50, %52 : vector<8x8xi32>
    %c2146121005_i32 = arith.constant 2146121005 : i32
    %54 = vector.broadcast %c2146121005_i32 : i32 to vector<8x8xi32>
    %55 = arith.muli %53, %54 : vector<8x8xi32>
    %c15_i32 = arith.constant 15 : i32
    %56 = vector.broadcast %c15_i32 : i32 to vector<8x8xi32>
    %57 = arith.shrui %55, %56 : vector<8x8xi32>
    %58 = arith.xori %55, %57 : vector<8x8xi32>
    %c-2073254261_i32 = arith.constant -2073254261 : i32
    %59 = vector.broadcast %c-2073254261_i32 : i32 to vector<8x8xi32>
    %60 = arith.muli %58, %59 : vector<8x8xi32>
    %c16_i32_30 = arith.constant 16 : i32
    %61 = vector.broadcast %c16_i32_30 : i32 to vector<8x8xi32>
    %62 = arith.shrui %60, %61 : vector<8x8xi32>
    %63 = arith.xori %60, %62 : vector<8x8xi32>
    %c429496730_i32 = arith.constant 429496730 : i32
    %64 = vector.broadcast %c429496730_i32 : i32 to vector<8x8xi32>
    %65 = arith.cmpi uge, %63, %64 : vector<8x8xi32>
    %cst_31 = arith.constant 0.000000e+00 : f32
    %66 = vector.broadcast %cst_31 : f32 to vector<8x8xf32>
    %67 = arith.select %65, %24, %66 : vector<8x8xi1>, vector<8x8xf32>
    %c0_32 = arith.constant 0 : index
    %c0_33 = arith.constant 0 : index
    %68 = vector.load %arg12[%c0_32, %c0_33] : memref<8x32xf32, #tpu.memory_space<vmem>>, vector<8x32xf32>
    %69 = vector.broadcast %21 : vector<8x1xf32> to vector<8x32xf32>
    %70 = arith.mulf %69, %68 : vector<8x32xf32>
    %cst_34 = arith.constant dense<0.000000e+00> : vector<8x32xf32>
    %71 = tpu.matmul %67, %10, %cst_34 {dimension_numbers = #tpu.dot_dimension_numbers<[1], [0], [0], [1], [0, 0, 1, 1], [], []>} : vector<8x8xf32>, vector<8x32xf32>, vector<8x32xf32> -> vector<8x32xf32>
    %72 = arith.addf %70, %71 : vector<8x32xf32>
    %c0_35 = arith.constant 0 : index
    %c0_36 = arith.constant 0 : index
    %73 = vector.load %arg12[%c0_35, %c0_36] : memref<8x32xf32, #tpu.memory_space<vmem>>, vector<8x32xf32>
    tpu.vector_store %arg12[%c0_35, %c0_36], %72 {strides = array<i32>} : memref<8x32xf32, #tpu.memory_space<vmem>>, vector<8x32xf32>,
    %c0_i32_37 = arith.constant 0 : i32
    %74 = arith.cmpi eq, %arg3, %c0_i32_37 : i32
    %75 = arith.extui %74 : i1 to i32
    %c0_i32_38 = arith.constant 0 : i32
    %76 = arith.cmpi ne, %75, %c0_i32_38 : i32
    scf.if %76 {
      %c0_39 = arith.constant 0 : index
      %c0_40 = arith.constant 0 : index
      %77 = vector.load %arg11[%c0_39, %c0_40] : memref<8x1xf32, #tpu.memory_space<vmem>>, vector<8x1xf32>
      %78 = tpu.reciprocal %77 {approx = true} : vector<8x1xf32> -> vector<8x1xf32>
      %c0_41 = arith.constant 0 : index
      %c0_42 = arith.constant 0 : index
      %79 = vector.load %arg12[%c0_41, %c0_42] : memref<8x32xf32, #tpu.memory_space<vmem>>, vector<8x32xf32>
      %cst_43 = arith.constant 1.11111116 : f32
      %80 = vector.broadcast %cst_43 : f32 to vector<8x1xf32>
      %81 = arith.mulf %78, %80 : vector<8x1xf32>
      %82 = vector.broadcast %81 : vector<8x1xf32> to vector<8x32xf32>
      %83 = arith.mulf %79, %82 : vector<8x32xf32>
      %c0_44 = arith.constant 0 : index
      %c0_45 = arith.constant 0 : index
      %c0_46 = arith.constant 0 : index
      %c0_47 = arith.constant 0 : index
      %84 = vector.load %arg9[%c0_44, %c0_45, %c0_46, %c0_47] : memref<1x1x8x32xf32, #tpu.memory_space<vmem>>, vector<1x1x8x32xf32>
      %85 = vector.shape_cast %84 : vector<1x1x8x32xf32> to vector<8x32xf32>
      %86 = vector.shape_cast %83 : vector<8x32xf32> to vector<1x1x8x32xf32>
      tpu.vector_store %arg9[%c0_44, %c0_45, %c0_46, %c0_47], %86 {strides = array<i32>} : memref<1x1x8x32xf32, #tpu.memory_space<vmem>>, vector<1x1x8x32xf32>,
    } else {
    }
    return
  }
  func.func @transform_0(%arg0: i32, %arg1: i32, %arg2: i32, %arg3: i32, %arg4: memref<1xi32, #tpu.memory_space<smem>>) -> (i32, i32, i32, i32) {
    %c0_i32 = arith.constant 0 : i32
    %c0_i32_0 = arith.constant 0 : i32
    return %arg0, %arg2, %arg1, %c0_i32 : i32, i32, i32, i32
  }
  func.func @transform_1(%arg0: i32, %arg1: i32, %arg2: i32, %arg3: i32, %arg4: memref<1xi32, #tpu.memory_space<smem>>) -> (i32, i32, i32, i32) {
    %c0_i32 = arith.constant 0 : i32
    %c0_i32_0 = arith.constant 0 : i32
    return %arg0, %arg2, %arg3, %c0_i32 : i32, i32, i32, i32
  }
  func.func @transform_2(%arg0: i32, %arg1: i32, %arg2: i32, %arg3: i32, %arg4: memref<1xi32, #tpu.memory_space<smem>>) -> (i32, i32, i32, i32) {
    %c0_i32 = arith.constant 0 : i32
    %c0_i32_0 = arith.constant 0 : i32
    return %arg0, %arg2, %arg3, %c0_i32 : i32, i32, i32, i32
  }
  func.func @transform_3(%arg0: i32, %arg1: i32, %arg2: i32, %arg3: i32, %arg4: memref<1xi32, #tpu.memory_space<smem>>) -> (i32, i32, i32) {
    %c0_i32 = arith.constant 0 : i32
    return %arg0, %arg1, %arg3 : i32, i32, i32
  }
  func.func @transform_4(%arg0: i32, %arg1: i32, %arg2: i32, %arg3: i32, %arg4: memref<1xi32, #tpu.memory_space<smem>>) -> (i32, i32, i32, i32) {
    %c0_i32 = arith.constant 0 : i32
    %c0_i32_0 = arith.constant 0 : i32
    return %arg0, %arg2, %arg1, %c0_i32 : i32, i32, i32, i32
  }
}

</mosaic_0001>

<bundles_post_ra>
// kernel: tpu_custom_call.1
= control target key start
LH: loop header
LB: loop body
LE: loop exit
PB: predicated region body
PF: predicated region fallthrough
CT: control target
= control target key end

     0   :  { %s1482_s0 = inlined_call_operand.<no memory space> [shape: s32[1], index: 0, kind: input, shape index: {}]   ;;  %s1483_s1 = inlined_call_operand.hbm [shape: f32[2,2,8,32], index: 1, kind: input, shape index: {}]   ;;  %s1484_s2 = inlined_call_operand.hbm [shape: f32[2,2,8,32], index: 2, kind: input, shape index: {}]   ;;  %s1485_s3 = inlined_call_operand.hbm [shape: f32[2,2,8,32], index: 3, kind: input, shape index: {}]   ;;  %s1486_s4 = inlined_call_operand.vmem [shape: bf16[2,8,8], index: 4, kind: input, shape index: {}]   ;;  %s1487_s5 = inlined_call_operand.hbm [shape: f32[2,2,8,32], index: 5, kind: output, shape index: {}]  }
   0x1   :  { %1498 = sst [smem:[#allocation24_spill]] %s1484_s2 }
   0x2   :  { %10 = sst [smem:[#allocation6]] %s1482_s0 }
   0x3   :  { %11 = vsyncpa [#allocation8], 0 }
   0x4   :  { %13 = vsyncpa [#allocation8 + $0x1], 0 }
   0x5   :  { %14 = vsyncpa [#allocation11], 0 }
   0x6   :  { %16 = vsyncpa [#allocation11 + $0x1], 0 }
   0x7   :  { %17 = vsyncpa [#allocation9], 0 }
   0x8   :  { %19 = vsyncpa [#allocation9 + $0x1], 0  ;;  %s1175_s20 = smov 0   ;;  %s1177_s21 = smov 0  }
   0x9   :  { %s1179_s22 = smov 0   ;;  %s1181_s23 = smov 0  }
   0xa   :  { %s1183_s24 = smov 0   ;;  %s1185_s25 = smov 0  }
   0xb   :  { %s1187_s26 = smov 0   ;;  %s1189_s0 = smov 0  }
   0xc LB: > { %1499 = sst [smem:[#allocation17_spill]] %s1104_s20  ;;  %s1216_s27 = sadd.s32 4294967295, %s1132_s0   ;;  %s1132_s0 = sphi %s1189_s0, %s25_s0   ;;  %s1128_s26 = sphi %s1187_s26, %s1528_s26   ;;  %s1124_s25 = sphi %s1185_s25, %s1527_s25   ;;  %s1120_s24 = sphi %s1183_s24, %s1526_s24   ;;  %s1116_s23 = sphi %s1181_s23, %s1525_s23   ;;  %s1112_s22 = sphi %s1179_s22, %s1531_s22   ;;  %s1108_s21 = sphi %s1177_s21, %s1530_s21   ;;  %s1104_s20 = sphi %s1175_s20, %s1529_s20  }
   0xd   : > { %1500 = sst [smem:[#allocation18_spill]] %s1124_s25  ;;  %s798_s28 = sadd.s32 4294967294, %s1132_s0  }
   0xe   : > { %1501 = sst [smem:[#allocation19_spill]] %s1128_s26  ;;  %s43_s29 = sadd.s32 1, %s1124_s25 }
   0xf   : > { %s51_s30 = sadd.s32 1, %s1128_s26  ;;  %p45_p0 = scmp.ge.s32.totalorder %s43_s29, 2 }
  0x10   : > { %s62_s6 = sadd.s32 1, %s1112_s22  ;;  %p69_p1 = scmp.ne.s32.totalorder %s1112_s22, %s1108_s21 }
  0x11   : > { %p70_p2 = scmp.eq.s32.totalorder %s1132_s0, 0  ;;  %s1533_s29 = smov (%p45_p0, %s43_s29), 0 }
  0x12   : > { %1502 = sst [smem:[#allocation20_spill]] %s1533_s29  ;;  %s1535_s30 = smov (!%p45_p0, %s51_s30), %s1128_s26 }
  0x13   : > { %s56_s7 = ssub.s32 %s1124_s25, %s1533_s29  ;;  %p1230_p3 = por %p70_p2, %p69_p1 }
  0x14   : > { %p53_p4 = scmp.ge.s32.totalorder %s1535_s30, 2  ;;  %p75_p5 = scmp.ne.s32.totalorder %s1108_s21, %s1104_s20 }
  0x15   : > { %p76_p6 = scmp.eq.s32.totalorder %s1216_s27, 0  ;;  %p193_p7 = scmp.eq.s32.totalorder %s1216_s27, 3 }
  0x16   : > { %s1537_s30 = smov (%p53_p4, %s1535_s30), 0  ;;  %p199_p10 = scmp.eq.s32.totalorder %s798_s28, 3 }
  0x17   : > { %1504 = sst [smem:[#allocation21_spill]] %s1537_s30  ;;  %p1240_p8 = por %p76_p6, %p75_p5 }
  0x18   : > { %p1244_p9 = por %p193_p7, %p69_p1  ;;  %s55_s11 = ssub.s32 %s1128_s26, %s1537_s30 }
  0x19   : > { %s1505_s9 = scalar_select %p1240_p8, 1, 0 }
  0x1a   : > { %s1506_s10 = scalar_select %p1244_p9, 1, 0 }
  0x1b   : > { %s57_s12 = sor.u32 %s56_s7, %s55_s11  ;;  %p1250_p12 = por %p199_p10, %p75_p5 }
  0x1c   : > { %p60_p11 = scmp.eq.s32.totalorder %s57_s12, 0  ;;  %p862_p13 = scmp.lt.s32.totalorder %s1132_s0, 4 }
  0x1d   : > { %s1507_s13 = scalar_select %p1250_p12, 1, 0 }
  0x1e   : > { %s1488_s14 = sand.u32 1, %s1112_s22   ;;  %s802_s17 = sshll.u32 %s1128_s26, 1 }
  0x1f   : > { %1508 = sst [smem:[#allocation22_spill]] %s1507_s13  ;;  %s1261_s16 = sshll.u32 %s1488_s14, 3 }
  0x20   : > { %s1257_s15 = scalar_select %p60_p11, %s1112_s22, %s62_s6  }
  0x21   : > { %s229_s18 = sadd.s32 %s1124_s25, %s802_s17  ;;  %p1267_p0 = pnand %p862_p13, %p1230_p3 }
  0x22   : > { %1509 = sst [smem:[#allocation23_spill]] %s1257_s15  ;;  %s1271_s28 = sshll.u32 %s229_s18, 7 }
  0x23   : > { %s1510_s19 = scalar_select %p1267_p0, 1, 0 }
  0x24   : > { %s240_s7 = sand.u32 1, %s1132_s0   ;;  %s1511_s2 = sld [smem:[#allocation24_spill]] }
  0x25   : > { %s244_s17 = scalar_lea.vmem [#allocation10], %s1261_s16  ;;  %s1285_s14 = scalar_lea.sflag [#allocation11], %s240_s7 }
  0x26   : > { %s254_s8 = sshll.u32 %s244_s17, 4  ;;  %p1291_p4 = pneg %p1267_p0  ;;  %s1282_s8 = int_to_ptr.vmem [resolvable:$true] %s254_s8 }
  0x2a   : > { %s1278_s6 = scalar_lea.hbm %s1511_s2, %s1271_s28  ;;  %s945_s17 = scalar_lea.hbm %s1511_s2, 512 }
  0x2b   : > { %s940_s18 = scalar_lea.hbm %s1278_s6, 128  ;;  %p946_p7 = scmp.lt.u32.totalorder %s1278_s6, %s1511_s2 }
  0x2c   : > { %p941_p3 = scmp.ne.s32.totalorder %s1278_s6, %s940_s18  ;;  %p947_p10 = scmp.lt.u32.totalorder %s945_s17, %s940_s18 }
  0x2d   : > { %p949_p13 = scmp.lt.u32.totalorder %s940_s18, %s1278_s6 }
  0x2e   : > { %p943_p5 = pnand %p1291_p4, %p941_p3  ;;  %p948_p11 = por %p947_p10, %p946_p7 }
  0x30   : > { %p944_p6 = pneg %p943_p5  ;;  %p950_p1 = por %p949_p13, %p948_p11 }
  0x32   : > { %p951_p2 = pnand %p950_p1, %p944_p6 }
  0x34   : > { %954 = shalt.err (!%p951_p2)
}
  0x35   : > { %s955_s7 = scalar_lea.vmem %s1282_s8, 128  ;;  %s1134_s11 = smov [#allocation10]  }
  0x36   : > { %p956_p3 = scmp.ne.s32.totalorder %s1282_s8, %s955_s7  ;;  %s960_s12 = sshll.u32 %s1134_s11, 4  ;;  %s961_s12 = int_to_ptr.vmem [resolvable:$false] %s960_s12 }
  0x37   : > { %s962_s26 = scalar_lea.vmem %s961_s12, 256  ;;  %p963_p9 = scmp.lt.s32.totalorder %s1282_s8, %s961_s12 }
  0x38   : > { %p958_p5 = pnand %p956_p3, %p1291_p4  ;;  %p964_p8 = scmp.lt.s32.totalorder %s962_s26, %s955_s7 }
  0x3a   : > { %p959_p12 = pneg %p958_p5  ;;  %p965_p7 = por %p964_p8, %p963_p9 }
  0x3c   : > { %p966_p10 = pnand %p965_p7, %p959_p12 }
  0x3e   : > { %969 = shalt.err (!%p966_p10)
}
  0x3f   : > { %854 = dma.hbm_to_vmem [thread:$0]  (!%p1267_p0), %s1278_s6, 128, %s1282_s8, %s1285_s14  }
  0x40   : > { %p1513_p1 = scmp.lt.s32.totalorder %s1132_s0, 5  ;;  %p1514_p2 = scmp.ge.s32.totalorder %s1132_s0, 1 }
  0x41   : > { %s1327_s7 = scalar_lea.hbm %s1483_s1, %s1271_s28  ;;  %s223_s11 = scalar_lea.vmem [#allocation7], %s1261_s16 }
  0x42   : > { %p1319_p6 = pnand %p1514_p2, %p1513_p1  ;;  %s233_s12 = sshll.u32 %s223_s11, 4  ;;  %s1330_s12 = int_to_ptr.vmem [resolvable:$true] %s233_s12 }
  0x43   : > { %s1336_s26 = scalar_lea.hbm %s1485_s3, %s1271_s28  ;;  %s1516_s2 = sand.u32 1, %s1112_s22  }
  0x44   : > { %s1515_s29 = scalar_select %p1319_p6, 1, 0 }
  0x45   : > { %s220_s25 = scalar_lea.sflag [#allocation8], %s1516_s2  ;;  %s970_s15 = scalar_lea.hbm %s1327_s7, 128 }
  0x46   : > { %p971_p8 = scmp.ne.s32.totalorder %s1327_s7, %s970_s15  ;;  %s975_s13 = scalar_lea.hbm %s1483_s1, 512 }
  0x47   : > { %p976_p11 = scmp.lt.u32.totalorder %s1327_s7, %s1483_s1  ;;  %p977_p13 = scmp.lt.u32.totalorder %s975_s13, %s970_s15 }
  0x48   : > { %p973_p9 = pnand %p971_p8, %p1291_p4  ;;  %p979_p5 = scmp.lt.u32.totalorder %s970_s15, %s1327_s7 }
  0x49   : > { %p978_p3 = por %p977_p13, %p976_p11 }
  0x4a   : > { %p974_p12 = pneg %p973_p9 }
  0x4b   : > { %p980_p7 = por %p979_p5, %p978_p3 }
  0x4d   : > { %p981_p10 = pnand %p980_p7, %p974_p12 }
  0x4f   : > { %984 = shalt.err (!%p981_p10)
}
  0x50   : > { %s985_s2 = scalar_lea.vmem %s1330_s12, 128  ;;  %s1135_s28 = smov [#allocation7]  }
  0x51   : > { %p986_p1 = scmp.ne.s32.totalorder %s1330_s12, %s985_s2  ;;  %s990_s6 = sshll.u32 %s1135_s28, 4  ;;  %s991_s6 = int_to_ptr.vmem [resolvable:$false] %s990_s6 }
  0x52   : > { %s992_s20 = scalar_lea.vmem %s991_s6, 256  ;;  %p993_p9 = scmp.lt.s32.totalorder %s1330_s12, %s991_s6 }
  0x53   : > { %p988_p2 = pnand %p986_p1, %p1291_p4  ;;  %p994_p6 = scmp.lt.s32.totalorder %s992_s20, %s985_s2 }
  0x55   : > { %p989_p8 = pneg %p988_p2  ;;  %p995_p11 = por %p994_p6, %p993_p9 }
  0x57   : > { %p996_p13 = pnand %p995_p11, %p989_p8 }
  0x59   : > { %999 = shalt.err (!%p996_p13)
}
  0x5a   : > { %851 = dma.hbm_to_vmem [thread:$0]  (!%p1267_p0), %s1327_s7, 128, %s1330_s12, %s220_s25  }
  0x5b   : > { %s265_s13 = scalar_lea.vmem [#allocation12], %s1261_s16  ;;  %s1000_s8 = scalar_lea.hbm %s1336_s26, 128 }
  0x5c   : > { %s275_s15 = sshll.u32 %s265_s13, 4  ;;  %p1001_p12 = scmp.ne.s32.totalorder %s1336_s26, %s1000_s8  ;;  %s276_s15 = int_to_ptr.vmem [resolvable:$true] %s275_s15 }
  0x5d   : > { %s1005_s11 = scalar_lea.hbm %s1485_s3, 512  ;;  %p1006_p5 = scmp.lt.u32.totalorder %s1336_s26, %s1485_s3 }
  0x5e   : > { %p1003_p6 = pnand %p1001_p12, %p1291_p4  ;;  %p1007_p7 = scmp.lt.u32.totalorder %s1005_s11, %s1000_s8 }
  0x5f   : > { %p1009_p1 = scmp.lt.u32.totalorder %s1000_s8, %s1336_s26 }
  0x60   : > { %p1004_p3 = pneg %p1003_p6  ;;  %p1008_p10 = por %p1007_p7, %p1006_p5 }
  0x62   : > { %p1010_p2 = por %p1009_p1, %p1008_p10 }
  0x64   : > { %p1011_p8 = pnand %p1010_p2, %p1004_p3 }
  0x66   : > { %1014 = shalt.err (!%p1011_p8)
}
  0x67   : > { %s1015_s25 = scalar_lea.vmem %s276_s15, 128  ;;  %s1136_s16 = smov [#allocation12]  }
  0x68   : > { %p1016_p9 = scmp.ne.s32.totalorder %s276_s15, %s1015_s25  ;;  %s1020_s7 = sshll.u32 %s1136_s16, 4  ;;  %s1021_s7 = int_to_ptr.vmem [resolvable:$false] %s1020_s7 }
  0x69   : > { %s1022_s12 = scalar_lea.vmem %s1021_s7, 256  ;;  %p1023_p12 = scmp.lt.s32.totalorder %s276_s15, %s1021_s7 }
  0x6a   : > { %p1018_p11 = pnand %p1016_p9, %p1291_p4  ;;  %p1024_p6 = scmp.lt.s32.totalorder %s1022_s12, %s1015_s25 }
  0x6c   : > { %p1019_p13 = pneg %p1018_p11  ;;  %p1025_p0 = por %p1024_p6, %p1023_p12 }
  0x6e   : > { %p1026_p5 = pnand %p1025_p0, %p1019_p13 }
  0x70   : > { %1029 = shalt.err (!%p1026_p5)
}
  0x71   : > { %p1517_p7 = scmp.ne.s32.totalorder %s1510_s19, 0  ;;  %p1518_p3 = scmp.ne.s32.totalorder %s1515_s29, 0 }
  0x72   : > { %s1383_s30 = sand.u32 (!%p1518_p3), 1, %s1108_s21   ;;  %p1519_p0 = scmp.ne.s32.totalorder (!%p1518_p3), %s1505_s9, 0 }
  0x73   : > { %857 = dma.hbm_to_vmem [thread:$0]  (!%p1517_p7), %s1336_s26, 128, %s276_s15, %s1285_s14  }
  0x74   : > { %297 = sbr.rel (%p1518_p3) target bundleno = 945 (0x3b1), region = 36  ;;  %s1386_s6 = sshll.u32 (!%p1518_p3), %s1383_s30, 3 }
  0x75   : > { %s300_s20 = scalar_lea.sflag (!%p1518_p3), [#allocation8], %s1383_s30  ;;  %s303_s13 = scalar_lea.vmem (!%p1518_p3), [#allocation7], %s1386_s6 }
  0x7b   : > { %1091 = dma.done.wait (%p1519_p0), %s300_s20, 128  }
  0x7c   : > { %1093 = vsyncadd (%p1519_p0), %s300_s20, 4294967168  ;;  %s308_s14 = sand.u32 1, %s1216_s27   ;;  %s312_s29 = scalar_lea.vmem [#allocation10], %s1386_s6 }
  0x7d   : > { %s309_s19 = scalar_lea.sflag [#allocation11], %s308_s14 }
  0x7e   : > { %1095 = dma.done.wait (%p1519_p0), %s309_s19, 256  }
  0x7f   : > { %1097 = vsyncadd (%p1519_p0), %s309_s19, 4294967040  ;;  %vm383_vm0 = vcmask 261120   ;;  %v1137_v0 = vmov 0.0   ;;  %vm1138_vm1 = vmmov 0   ;;  %v387_v1 = vld [vmem:[%s312_s29] sm:$0xff]  ;;  %v385_v2 = vld [vmem:[%s303_s13] sm:$0xff]  ;;  %v494_v17 = vlaneseq }
  0x80   : > { %830 = vmatprep.subr.mxu0 %v1137_v0  ;;  %384 = vst.msk [vmem:[#allocation4] sm:$0xff] %vm383_vm0, %v1137_v0  ;;  %832 = vmatprep.mubr.msk.f32.mxu0 %vm1138_vm1, %v1137_v0  ;;  %v386_v3 = vmul.f32 0.17677669, %v385_v2  ;;  %vm380_vm2 = vcmask 7168   ;;  %v1139_v4 = vmov -1e+30  }
  0x81   : > { %835 = vmatprep.subr.mxu1 %v1137_v0  ;;  %837 = vmatprep.mubr.msk.f32.mxu1 %vm1138_vm1, %v1137_v0  ;;  %381 = vst.msk [vmem:[#allocation2] sm:$0xff] %vm380_vm2, %v1139_v4  ;;  %382 = vst.msk [vmem:[#allocation3] sm:$0xff] %vm380_vm2, %v1137_v0  ;;  %p366_p4 = scmp.lt.s32.totalorder %s1120_s24, 1  ;;  %vm469_vm3 = vcmask 64512   ;;  %v1140_v11 = vmov 0   ;;  %s321_s18 = scalar_lea.vmem [#allocation12], %s1386_s6 }
  0x82   : > { %831 = vmatpush3.xpose.msk.msra.mxu0 %vm383_vm0, %v387_v1  ;;  %932 = vset.pattern.permute.xlu0 %v1140_v11  ;;  %v388_v16 = vld [vmem:[%s321_s18] sm:$0xff]  ;;  %s818_s17 = sshll.u32 %s1120_s24, 1  ;;  %v495_v18 = vshrl.u32 %v494_v17, 7  ;;  %s511_s28 = sld [smem:[#allocation6]]  ;;  %v500_v21 = vand.u32 127, %v494_v17 }
  0x83   : > { %s367_s27 = scalar_select %p366_p4, %s1120_s24, 1  ;;  %933 = vset.pattern.permute.xlu1 %v1140_v11  ;;  %836 = vmatpush3.msra.mxu1 %v388_v16 }
  0x84   : > { %s1415_s11 = sadd.s32 %s1116_s23, %s818_s17  ;;  %s365_s24 = scalar_lea.vmem [#allocation13], %s1386_s6 }
  0x85   : > { %833 = vmatmul.mubr.msk.f32.vlgmr.msra.gmra.mrb[0].mxu0 %vm383_vm0, %v386_v3  ;;  %s815_s9 = sshll.u32 %s367_s27, 2  ;;  %s819_s2 = sshll.u32 %s1415_s11, 3 }
  0x86   : > { %s375_s8 = scalar_lea.vmem %s1486_s4, %s815_s9  ;;  %v507_v19 = vstv %s819_s2  ;;  %s823_s23 = sshll.u32 %s1415_s11, 7 }
  0x87   : > { %v389_v5 = vld [vmem:[%s375_s8] sm:$0xf]  ;;  %v508_v20 = vadd.s32 %v507_v19, %v495_v18  ;;  %v524_v49 = vld [vmem:[#allocation4] sm:$0xff]  ;;  %s637_s25 = sshll.u32 %s365_s24, 4  ;;  %s1427_s12 = scalar_lea.hbm %s1487_s5, %s823_s23  ;;  %s1429_s25 = int_to_ptr.vmem [resolvable:$true] %s637_s25 }
  0x88   : > { %v390_v6 = vunpack.c.l.bf16 %v389_v5  ;;  %v468_v12 = vld [vmem:[#allocation2] sm:$0xff]  ;;  %v512_v24 = vstv %s511_s28  ;;  %v485_v42 = vld [vmem:[#allocation3] sm:$0xff]  ;;  %s621_s20 = scalar_lea.sflag [#allocation9], %s1383_s30  ;;  %s1030_s13 = scalar_lea.vmem %s1429_s25, 128 }
  0x89   : > { %v509_v22 = vmul.u32 8, %v508_v20  ;;  %p1031_p10 = scmp.ne.s32.totalorder %s1429_s25, %s1030_s13  ;;  %p1520_p1 = scmp.ne.s32.totalorder %s1506_s10, 0 }
  0x8a   : > { %s1141_s6 = smov [#allocation13]  }
  0x8b   : > { %v510_v23 = vadd.s32 %v509_v22, %v500_v21  ;;  %p1032_p2 = pnand %p1031_p10, %p1520_p1  ;;  %s1034_s14 = sshll.u32 %s1141_s6, 4  ;;  %s1035_s14 = int_to_ptr.vmem [resolvable:$false] %s1034_s14 }
  0x8c   : > { %s1036_s19 = scalar_lea.vmem %s1035_s14, 256  ;;  %p1037_p9 = scmp.lt.s32.totalorder %s1429_s25, %s1035_s14 }
  0x8d   : > { %v513_v25 = vxor.u32 %v512_v24, %v510_v23  ;;  %p1033_p8 = pneg %p1032_p2  ;;  %p1038_p11 = scmp.lt.s32.totalorder %s1036_s19, %s1030_s13 }
  0x8f   : > { %v514_v26 = vshrl.u32 %v513_v25, 16  ;;  %p1039_p13 = por %p1038_p11, %p1037_p9 }
  0x91   : > { %v515_v27 = vxor.u32 %v514_v26, %v513_v25  ;;  %p1040_p12 = pnand %p1039_p13, %p1033_p8 }
  0x93   : > { %v516_v28 = vmul.u32 2146121005, %v515_v27 }
  0x95   : > { %v517_v29 = vshrl.u32 %v516_v28, 15 }
  0x97   : > { %v518_v30 = vxor.u32 %v517_v29, %v516_v28 }
  0x99   : > { %v519_v33 = vmul.u32 2221713035, %v518_v30 }
  0x9b   : > { %v520_v35 = vshrl.u32 %v519_v33, 16 }
  0x9d   : > { %v521_v36 = vxor.u32 %v520_v35, %v519_v33 }
  0x9f   : > { %vm522_vm4 = vcmp.ge.u32.totalorder %v521_v36, 429496730 }
 0x158   : > { %v464_v7 = vpop.f32.mrb[0].mxu0 }
 0x159   : > { %v465_v8 = vadd.f32 %v464_v7, %v390_v6  ;;  %v834_v9 = vpop.f32.mrb[1].mxu0 }
 0x15b   : > { %v470_v10 = vsel %vm469_vm3, %v465_v8, -inf }
 0x15c   : > { %471 = vmax.xlane.f32.xlu0 %v470_v10 }
 0x1e9   : > { %v472_v13 = vpop.xlane.xlu0 %471 }
 0x1ea   : > { %v473_v14 = vmax.f32 %v468_v12, %v472_v13 }
 0x1ec   : > { %v474_v15 = vsub.f32 %v468_v12, %v473_v14  ;;  %493 = vst.msk [vmem:[#allocation2] sm:$0xff] %vm380_vm2, %v473_v14  ;;  %479 = vperm.xlu0 %932, %v473_v14  }
 0x1ee   : > { %v475_v40 = vmul.f32 1.442695, %v474_v15 }
 0x26b   : > { %v480_v31 = vpop.permute.xlu0 %479 }
 0x26c   : > { %v482_v32 = vsub.f32 %v465_v8, %v480_v31 }
 0x26e   : > { %v483_v34 = vmul.f32 1.442695, %v482_v32 }
 0x270   : > { %934 = vpow2.f32 %v483_v34 }
 0x271   : > { %936 = vpow2.f32 %v475_v40 }
 0x27a   : > { %v935_v37 = vpop.eup %934 }
 0x27b   : > { %v523_v38 = vsel %vm522_vm4, %v935_v37, 0.0  ;;  %v487_v39 = vsel %vm469_vm3, %v935_v37, 0.0  ;;  %v937_v41 = vpop.eup %936 }
 0x27c   : > { %838 = vmatmul.mubr.msk.f32.vlgmr.msra.gmra.mrb[0].mxu1 %vm469_vm3, %v523_v38  ;;  %488 = vadd.xlane.f32.xlu1 %v487_v39  ;;  %v486_v43 = vmul.f32 %v937_v41, %v485_v42 }
 0x28d   : > { %527 = vperm.xlu1 %933, %v937_v41  }
 0x309   : > { %v489_v44 = vpop.xlane.xlu1 %488 }
 0x30a   : > { %v490_v45 = vadd.f32 %v489_v44, %v486_v43 }
 0x30c   : > { %492 = vst.msk [vmem:[#allocation3] sm:$0xff] %vm380_vm2, %v490_v45 }
 0x30d   : > { %v528_v50 = vpop.permute.xlu1 %527 }
 0x30e   : > { %v530_v51 = vmul.f32 %v528_v50, %v524_v49 }
 0x313   : > { %v609_v46 = vld [vmem:[#allocation3] sm:$0xff] }
 0x314   : > { %938 = vrcp.f32 %v609_v46 }
 0x31e   : > { %v939_v47 = vpop.eup %938 }
 0x31f   : > { %v612_v48 = vmul.f32 1.1111112, %v939_v47 }
 0x321   : > { %615 = vperm.xlu1 %933, %v612_v48  }
 0x34f   : > { %v600_v52 = vpop.f32.mrb[0].mxu1 }
 0x350   : > { %v604_v53 = vadd.f32 %v600_v52, %v530_v51  ;;  %v839_v54 = vpop.f32.mrb[1].mxu1 }
 0x352   : > { %605 = vst.msk [vmem:[#allocation4] sm:$0xff] %vm383_vm0, %v604_v53 }
 0x359   : > { %v611_v55 = vld [vmem:[#allocation4] sm:$0xff] }
 0x3a0   : > { %v616_v56 = vpop.permute.xlu1 %615 }
 0x3a1   : > { %v618_v57 = vmul.f32 %v616_v56, %v611_v55 }
 0x3a3   : > { %619 = vst.msk [vmem:[%s365_s24] sm:$0xff] %vm383_vm0, %v618_v57 }
 0x3a4   : > { %1043 = shalt.err (!%p1040_p12)
}
 0x3a5   : > { %s1044_s30 = scalar_lea.hbm %s1427_s12, 128  ;;  %s1048_s9 = scalar_lea.hbm %s1487_s5, 512 }
 0x3a6   : > { %p1045_p6 = scmp.ne.s32.totalorder %s1427_s12, %s1044_s30  ;;  %p1049_p3 = scmp.lt.u32.totalorder %s1427_s12, %s1487_s5 }
 0x3a7   : > { %p1050_p0 = scmp.lt.u32.totalorder %s1048_s9, %s1044_s30  ;;  %p1052_p10 = scmp.lt.u32.totalorder %s1044_s30, %s1427_s12 }
 0x3a8   : > { %p1046_p5 = pnand %p1045_p6, %p1520_p1 }
 0x3a9   : > { %p1051_p4 = por %p1050_p0, %p1049_p3 }
 0x3aa   : > { %p1047_p7 = pneg %p1046_p5 }
 0x3ab   : > { %p1053_p2 = por %p1052_p10, %p1051_p4 }
 0x3ad   : > { %p1054_p8 = pnand %p1053_p2, %p1047_p7 }
 0x3af   : > { %1057 = shalt.err (!%p1054_p8)
}
 0x3b0   : > { %846 = dma.vmem_to_hbm [thread:$0]  (%p1520_p1), %s1429_s25, 128, %s1427_s12, %s621_s20  }
 0x3b1 PF: > { %s1521_s8 = sld [smem:[#allocation17_spill]]  ;;  %s1522_s18 = sld [smem:[#allocation22_spill]] }
 0x3b2   : > { %p863_p9 = scmp.ge.s32.totalorder %s1132_s0, 2 }
 0x3b7   : > { %s649_s17 = sand.u32 1, %s1521_s8   ;;  %p1523_p11 = scmp.ne.s32.totalorder %s1522_s18, 0 }
 0x3b8   : > { %s650_s11 = scalar_lea.sflag [#allocation9], %s649_s17 }
 0x3b9   : > { %p859_p13 = pnand %p863_p9, %p1523_p11 }
 0x3bb   : > { %1099 = dma.done.wait (!%p859_p13), %s650_s11, 128  }
 0x3bc   : > { %1101 = vsyncadd (!%p859_p13), %s650_s11, 4294967168  ;;  %s25_s0 = sadd.s32 1, %s1132_s0   ;;  %s1524_s10 = sld [smem:[#allocation23_spill]] }
 0x3bd   : > { %p22_p12 = scmp.ge.s32.totalorder %s25_s0, 6   ;;  %s1525_s23 = sld [smem:[#allocation18_spill]] }
 0x3be   : > { %s1526_s24 = sld [smem:[#allocation19_spill]]  ;;  %s1527_s25 = sld [smem:[#allocation20_spill]] }
 0x3bf   : > { %s1528_s26 = sld [smem:[#allocation21_spill]]  ;;  %s1529_s20 = smov %s1108_s21 }
 0x3c0   : > { %s1530_s21 = smov %s1112_s22  ;;  %24 = sbr.rel (!%p22_p12) target bundleno = 12 (0xc), region = 116 }
 0x3c2   : > { %s1531_s22 = smov %s1524_s10 }
 0x3c7   :  { %655 = vsyncpa [#allocation8], 1 }
 0x3c8   :  { %657 = vsyncpa [#allocation8 + $0x1], 1 }
 0x3c9   :  { %658 = vsyncpa [#allocation11], 1 }
 0x3ca   :  { %660 = vsyncpa [#allocation11 + $0x1], 1 }
 0x3cb   :  { %661 = vsyncpa [#allocation9], 1 }
 0x3cc   :  { %663 = vsyncpa [#allocation9 + $0x1], 1 }

</bundles_post_ra>
